<compile_context>
chip_gen: v7x
topology: tpu7x:2x2x1
jax: 0.10.0
libtpu: 0.0.40
codegen_flags: <defaults>
</compile_context>

<pallas_src>
import jax
import jax.numpy as jnp
from jax.experimental import pallas as pl
from jax.experimental.pallas import tpu as pltpu


def _biased_relu_row_kernel(x_ref, b_ref, o_ref):
    # x_ref: (rb, cb) block; b_ref: (rb, 1) per-row bias block (lane-broadcasts).
    o_ref[...] = jnp.maximum(x_ref[...] - b_ref[...], jnp.zeros((), x_ref.dtype))


def _biased_relu_scalar_kernel(x_ref, b_ref, o_ref):
    # x_ref: (rb, cb) block; b_ref: (1,) scalar bias resident in SMEM.
    b = b_ref[0].astype(x_ref.dtype)
    o_ref[...] = jnp.maximum(x_ref[...] - b, jnp.zeros((), x_ref.dtype))


def _device_tuning():
    """Returns (target_block_bytes, vmem_limit_bytes, is_v7) for the local TPU."""
    kind = ""
    try:
        kind = jax.devices()[0].device_kind.lower()
    except Exception:
        pass
    if "v7" in kind or "7x" in kind:
        # 8 MiB x 2 arrays x 2 buffers = 32 MiB; raise scoped VMEM (64 MiB phys).
        return 8 << 20, 48 << 20, True
    if "v6" in kind:
        # 4 MiB x 2 x 2 = 16 MiB fits the 32 MiB default scoped VMEM, no flag.
        return 4 << 20, None, False
    # v5e and older: 2 MiB x 2 x 2 = 8 MiB fits the 16 MiB default scoped VMEM.
    return 2 << 20, None, False


def _ceil_div(a, b):
    return -(-a // b)


def biased_relu(x, bias, *, row_block=None, col_block=None,
                target_block_bytes=None):
    """Pallas BiasedReLU.forward for NCHW inputs (bias size must be 1 or C)."""
    B, C, H, W = x.shape
    rows, cols = B * C, H * W
    itemsize = jnp.dtype(x.dtype).itemsize

    if bias.size not in (1, C):
        raise ValueError(f"bias must have 1 or C={C} elements, got {bias.size}")

    auto_bytes, vmem_limit, is_v7 = _device_tuning()
    if target_block_bytes is None:
        target_block_bytes = auto_bytes

    # Packed sublane tile for this dtype: 8 f32 / 16 bf16 / 32 int8 rows.
    sub = max(8, 32 // max(itemsize, 1))

    x2 = x.reshape(rows, cols)

    # ---- column block: full extent (no pad, no post-slice) or 128-lane tiles.
    if col_block is not None:
        cb = min(col_block, cols)
    elif sub * cols * itemsize <= target_block_bytes or cols <= 128:
        cb = cols                      # full-extent last dim: always legal
    else:
        cb = max(128, (target_block_bytes // (sub * itemsize)) // 128 * 128)
        cb = min(cb, cols)             # cols > 128 here; tail block is masked

    # ---- row block: fill the remaining byte budget, multiple of the sublane tile.
    if row_block is not None:
        rb = min(row_block, rows)
    else:
        rb = max(sub, (target_block_bytes // (cb * itemsize)) // sub * sub)
        if rb >= rows:
            rb = rows                  # full-extent first dim: always legal

    # ---- v7x only: ensure >= 2 grid steps so both TensorCores get work,
    # but never shrink a block below ~1 MiB.
    if is_v7 and row_block is None and col_block is None:
        if _ceil_div(rows, rb) * _ceil_div(cols, cb) < 2:
            min_block = 1 << 20
            half_rb = max(sub, (rb // 2) // sub * sub)
            half_cb = max(128, (cb // 2) // 128 * 128)
            if rows >= 2 * sub and half_rb * cb * itemsize >= min_block:
                rb = half_rb
            elif cols >= 256 and rb * half_cb * itemsize >= min_block:
                cb = half_cb

    grid = (_ceil_div(rows, rb), _ceil_div(cols, cb))
    x_spec = pl.BlockSpec((rb, cb), lambda i, j: (i, j))
    out_spec = pl.BlockSpec((rb, cb), lambda i, j: (i, j))

    if bias.size == 1:
        # Scalar-bias fast path: one f32 word in SMEM, no broadcast materialization.
        kernel = _biased_relu_scalar_kernel
        bias_arg = bias.reshape(1).astype(jnp.float32)
        bias_spec = pl.BlockSpec(memory_space=pltpu.MemorySpace.SMEM)
        bias_bytes = 4
    else:
        # Per-row bias column vector (row index = b*C + c), grid-blocked (rb, 1).
        kernel = _biased_relu_row_kernel
        bias_arg = jnp.tile(bias.astype(x.dtype).reshape(1, C),
                            (B, 1)).reshape(rows, 1)
        bias_spec = pl.BlockSpec((rb, 1), lambda i, j: (i, 0))
        bias_bytes = rows * itemsize

    out2 = pl.pallas_call(
        kernel,
        out_shape=jax.ShapeDtypeStruct((rows, cols), x.dtype),
        grid_spec=pltpu.PrefetchScalarGridSpec(
            num_scalar_prefetch=0,
            grid=grid,
            in_specs=[x_spec, bias_spec],
            out_specs=out_spec,
        ),
        compiler_params=pltpu.CompilerParams(
            dimension_semantics=("parallel", "parallel"),
            vmem_limit_bytes=vmem_limit,
        ),
        cost_estimate=pl.CostEstimate(
            flops=2 * rows * cols,                      # subtract + max
            transcendentals=0,
            bytes_accessed=2 * rows * cols * itemsize + bias_bytes,
        ),
    )(x2, bias_arg)

    return out2.reshape(B, C, H, W)


if __name__ == "__main__":
    key = jax.random.PRNGKey(0)
    kx, kb = jax.random.split(key)

    # Per-channel bias (num_parameters == C).
    B, C, H, W = 2, 4, 16, 16
    x = jax.random.normal(kx, (B, C, H, W), dtype=jnp.float32)
    bias = jax.random.uniform(kb, (C,), minval=-0.1, maxval=0.1, dtype=jnp.float32)

    out = biased_relu(x, bias)
    jax.block_until_ready(out)
    ref = jnp.maximum(x - bias.reshape(1, C, 1, 1), 0.0)
    assert out.shape == (B, C, H, W)
    assert jnp.allclose(out, ref, atol=1e-6), "per-channel mismatch vs reference"

    # Scalar bias (num_parameters == 1) -> SMEM fast path.
    bias1 = jax.random.uniform(kb, (1,), minval=-0.1, maxval=0.1, dtype=jnp.float32)
    out1 = biased_relu(x, bias1)
    jax.block_until_ready(out1)
    ref1 = jnp.maximum(x - bias1, 0.0)
    assert jnp.allclose(out1, ref1, atol=1e-6), "scalar-bias mismatch vs reference"

    # Multi-step 2D grid (forced small row/col blocks): exercises the blocked
    # (rb, 1) bias across row blocks and column tiling with a masked tail block.
    B2, C2, H2, W2 = 8, 4, 16, 20           # cols = 320 -> 128,128,64(masked)
    xb = jax.random.normal(kx, (B2, C2, H2, W2), dtype=jnp.float32)
    biasb = jax.random.uniform(kb, (C2,), minval=-0.1, maxval=0.1, dtype=jnp.float32)
    outb = biased_relu(xb, biasb, row_block=8, col_block=128)
    jax.block_until_ready(outb)
    refb = jnp.maximum(xb - biasb.reshape(1, C2, 1, 1), 0.0)
    assert jnp.allclose(outb, refb, atol=1e-6), "multi-block mismatch vs reference"

    # Non-128-multiple spatial size with full-extent column block (no wrapper pad).
    xc = jax.random.normal(kx, (2, 3, 10, 10), dtype=jnp.float32)
    biasc = jax.random.uniform(kb, (3,), minval=-0.1, maxval=0.1, dtype=jnp.float32)
    outc = biased_relu(xc, biasc)
    jax.block_until_ready(outc)
    refc = jnp.maximum(xc - biasc.reshape(1, 3, 1, 1), 0.0)
    assert jnp.allclose(outc, refc, atol=1e-6), "odd-shape mismatch vs reference"

    print("KERNEL_OK")
</pallas_src>

<mosaic_0001>
module attributes {stable_mosaic.version = 11 : i64} {
  func.func @_biased_relu_row_kernel(%arg0: i32, %arg1: i32, %arg2: memref<8x256xf32, #tpu.memory_space<vmem>>, %arg3: memref<8x1xf32, #tpu.memory_space<vmem>>, %arg4: memref<8x256xf32, #tpu.memory_space<vmem>>) attributes {dimension_semantics = [#tpu.dimension_semantics<parallel>, #tpu.dimension_semantics<parallel>], iteration_bounds = array<i64: 1, 1>, scalar_prefetch = 0 : i64, scratch_operands = 0 : i64, tpu.core_type = #tpu.core_type<tc>, window_params = [{transform_indices = @transform_0, window_bounds = array<i64: 8, 256>}, {transform_indices = @transform_1, window_bounds = array<i64: 8, 1>}, {transform_indices = @transform_2, window_bounds = array<i64: 8, 256>}]} {
    %c0 = arith.constant 0 : index
    %c0_0 = arith.constant 0 : index
    %0 = vector.load %arg2[%c0, %c0_0] : memref<8x256xf32, #tpu.memory_space<vmem>>, vector<8x256xf32>
    %c0_1 = arith.constant 0 : index
    %c0_2 = arith.constant 0 : index
    %1 = vector.load %arg3[%c0_1, %c0_2] : memref<8x1xf32, #tpu.memory_space<vmem>>, vector<8x1xf32>
    %2 = vector.broadcast %1 : vector<8x1xf32> to vector<8x256xf32>
    %3 = arith.subf %0, %2 : vector<8x256xf32>
    %cst = arith.constant 0.000000e+00 : f32
    %4 = vector.broadcast %cst : f32 to vector<8x256xf32>
    %5 = arith.maximumf %3, %4 : vector<8x256xf32>
    %c0_3 = arith.constant 0 : index
    %c0_4 = arith.constant 0 : index
    %6 = vector.load %arg4[%c0_3, %c0_4] : memref<8x256xf32, #tpu.memory_space<vmem>>, vector<8x256xf32>
    tpu.vector_store %arg4[%c0_3, %c0_4], %5 {strides = array<i32>} : memref<8x256xf32, #tpu.memory_space<vmem>>, vector<8x256xf32>,
    return
  }
  func.func @transform_0(%arg0: i32, %arg1: i32) -> (i32, i32) {
    %c0_i32 = arith.constant 0 : i32
    return %arg0, %arg1 : i32, i32
  }
  func.func @transform_1(%arg0: i32, %arg1: i32) -> (i32, i32) {
    %c0_i32 = arith.constant 0 : i32
    %c0_i32_0 = arith.constant 0 : i32
    return %arg0, %c0_i32 : i32, i32
  }
  func.func @transform_2(%arg0: i32, %arg1: i32) -> (i32, i32) {
    %c0_i32 = arith.constant 0 : i32
    return %arg0, %arg1 : i32, i32
  }
}

</mosaic_0001>

<bundles_post_ra>
// kernel: tpu_custom_call.1
= control target key start
LH: loop header
LB: loop body
LE: loop exit
PB: predicated region body
PF: predicated region fallthrough
CT: control target
= control target key end

     0   :  { %7 = vsyncpa [#allocation3], 0  ;;  %s150_s0 = inlined_call_operand.hbm [shape: f32[8,256], index: 0, kind: input, shape index: {}]   ;;  %s151_s1 = inlined_call_operand.vmem [shape: f32[8,1], index: 1, kind: input, shape index: {}]   ;;  %s152_s2 = inlined_call_operand.hbm [shape: f32[8,256], index: 2, kind: output, shape index: {}]  }
   0x1   :  { %8 = vsyncpa [#allocation4], 0  ;;  %s105_s9 = smov [#allocation2]   ;;  %s57_s13 = scalar_lea.hbm %s150_s0, 256 }
   0x2   :  { %s15_s10 = sshll.u32 %s105_s9, 4  ;;  %p58_p0 = scmp.ne.s32.totalorder %s150_s0, %s57_s13  ;;  %s16_s10 = int_to_ptr.vmem [resolvable:$true] %s15_s10 }
   0x3   :  { %p61_p1 = scmp.lt.u32.totalorder %s57_s13, %s150_s0 }
   0x5   :  { %p63_p2 = pnand %p61_p1, %p58_p0 }
   0x7   :  { %66 = shalt.err (!%p63_p2)
}
   0x8   :  { %s67_s18 = scalar_lea.vmem %s16_s10, 256  ;;  %p72_p4 = scmp.lt.s32.totalorder %s16_s10, %s16_s10 }
   0x9   :  { %p68_p3 = scmp.ne.s32.totalorder %s16_s10, %s67_s18  ;;  %p73_p5 = scmp.lt.s32.totalorder %s67_s18, %s67_s18 }
   0xb   :  { %p74_p6 = por %p73_p5, %p72_p4 }
   0xd   :  { %p75_p7 = pnand %p74_p6, %p68_p3 }
   0xf   :  { %78 = shalt.err (!%p75_p7)
}
  0x10   :  { %18 = dma.hbm_to_vmem [thread:$0]  %s150_s0, 256, %s16_s10, [#allocation3]  }
  0x11   :  { %101 = dma.done.wait [#allocation3], 256  }
  0x12   :  { %102 = vsyncadd [#allocation3], 4294967040  ;;  %v106_v0 = vmov 0   ;;  %v26_v1 = vld [vmem:[%s151_s1] sm:$0xff]  ;;  %v25_v3 = vld [vmem:[#allocation2 + $0x8] sm:$0xff]  ;;  %s107_s23 = smov [#allocation5]  }
  0x13   :  { %56 = vset.pattern.permute.xlu0 %v106_v0  ;;  %v24_v2 = vld [vmem:[#allocation2] sm:$0xff]  ;;  %s44_s24 = sshll.u32 %s107_s23, 4  ;;  %s45_s24 = int_to_ptr.vmem [resolvable:$true] %s44_s24 }
  0x14   :  { %29 = vperm.xlu0 %56, %v26_v1   ;;  %s79_s0 = scalar_lea.vmem %s45_s24, 256  ;;  %p84_p9 = scmp.lt.s32.totalorder %s45_s24, %s45_s24 }
  0x15   :  { %p80_p8 = scmp.ne.s32.totalorder %s45_s24, %s79_s0  ;;  %p85_p10 = scmp.lt.s32.totalorder %s79_s0, %s79_s0 }
  0x17   :  { %p86_p11 = por %p85_p10, %p84_p9 }
  0x19   :  { %p87_p12 = pnand %p86_p11, %p80_p8 }
  0x93   :  { %v30_v4 = vpop.permute.xlu0 %29 }
  0x94   :  { %v32_v5 = vsub.f32 %v24_v2, %v30_v4  ;;  %v33_v6 = vsub.f32 %v25_v3, %v30_v4 }
  0x96   :  { %v34_v7 = vmax.f32 %v32_v5, 0.0  ;;  %v35_v8 = vmax.f32 %v33_v6, 0.0 }
  0x98   :  { %36 = vst [vmem:[#allocation5] sm:$0xff] %v34_v7  ;;  %37 = vst [vmem:[#allocation5 + $0x8] sm:$0xff] %v35_v8 }
  0x99   :  { %90 = shalt.err (!%p87_p12)
}
  0x9a   :  { %s91_s26 = scalar_lea.hbm %s152_s2, 256 }
  0x9b   :  { %p92_p13 = scmp.ne.s32.totalorder %s152_s2, %s91_s26  ;;  %p95_p0 = scmp.lt.u32.totalorder %s91_s26, %s152_s2 }
  0x9d   :  { %p97_p1 = pnand %p95_p0, %p92_p13 }
  0x9f   :  { %100 = shalt.err (!%p97_p1)
}
  0xa0   :  { %47 = dma.vmem_to_hbm [thread:$0]  %s45_s24, 256, %s152_s2, [#allocation4]  }
  0xa1   :  { %103 = dma.done.wait [#allocation4], 256  }
  0xa2   :  { %104 = vsyncadd [#allocation4], 4294967040 }
  0xa3   :  { %51 = vsyncpa [#allocation3], 1 }
  0xa4   :  { %52 = vsyncpa [#allocation4], 1 }

</bundles_post_ra>
